<compile_context>
chip_gen: v5e
topology: v5e:2x2
jax: 0.10.0
libtpu: 0.0.40
codegen_flags: <defaults>
</compile_context>

<pallas_src>
import jax
import jax.numpy as jnp
from jax.experimental import pallas as pl
from jax.experimental.pallas import tpu as pltpu


def _round_up(n, m):
    return (n + m - 1) // m * m


def mlp_kernel(xt_ref, w1t_ref, b1_ref, w2t_ref, b2_ref, w3c_ref, b3_ref, o_ref):
    # Batch lives on the lane axis everywhere below.
    # Layer 1: (64,12) @ (12,TB) + (64,1) -> sigmoid
    h1 = jnp.dot(w1t_ref[...], xt_ref[...], preferred_element_type=jnp.float32)
    h1 = jax.nn.sigmoid(h1 + b1_ref[...])
    # Dropout1: identity at inference.
    # TODO(synk): add stochastic dropout via pltpu.prng_random_bits if a
    # training-mode kernel is ever needed.
    # Layer 2: (32,64) @ (64,TB) + (32,1) -> sigmoid
    h2 = jnp.dot(w2t_ref[...], h1, preferred_element_type=jnp.float32)
    h2 = jax.nn.sigmoid(h2 + b2_ref[...])
    # Dropout2: identity at inference.
    # Layer 3 on VPU + sublane reduce (avoids a 1-lane-wide MXU result):
    # (32,TB) * (32,1) -> sum over axis 0 -> (1,TB) lane-dense output slab.
    o_ref[...] = jnp.sum(h2 * w3c_ref[...], axis=0, keepdims=True) + b3_ref[...]


def simple_dnn_forward(x, params, block_rows=2048):
    """x: (N, 3, 4) float32 -> (N, 1) float32."""
    w1, b1, w2, b2, w3, b3 = params
    n = x.shape[0]
    x_flat = x.reshape(n, -1).astype(jnp.float32)   # (N, 12), row-major flatten
    d_in = x_flat.shape[1]

    # Batch tile: multiple of 128 (lane width) so multi-tile blocks are legal
    # and stores are unmasked; pad N up to a multiple of the tile.
    tb = min(block_rows, _round_up(n, 128))
    n_pad = _round_up(n, tb)
    if n_pad != n:
        x_flat = jnp.pad(x_flat, ((0, n_pad - n), (0, 0)))
    xt = x_flat.T                                   # (12, N_pad): batch on lanes

    # Weights/biases oriented for batch-on-lanes compute.
    w1t = w1.T                                      # (64, 12)
    w2t = w2.T                                      # (32, 64)
    w3c = w3.reshape(-1, 1)                         # (32, 1)
    b1c = b1.reshape(-1, 1)                         # (64, 1)
    b2c = b2.reshape(-1, 1)                         # (32, 1)
    b3c = b3.reshape(1, 1)                          # (1, 1)

    num_tiles = n_pad // tb

    def resident(a):  # full-array block, same tile every grid step -> stays in VMEM
        return pl.BlockSpec(a.shape, lambda i: (0, 0))

    out = pl.pallas_call(
        mlp_kernel,
        out_shape=jax.ShapeDtypeStruct((1, n_pad), jnp.float32),
        grid_spec=pltpu.PrefetchScalarGridSpec(
            num_scalar_prefetch=0,
            grid=(num_tiles,),
            in_specs=[pl.BlockSpec((d_in, tb), lambda i: (0, i)),
                      resident(w1t), resident(b1c),
                      resident(w2t), resident(b2c),
                      resident(w3c), resident(b3c)],
            out_specs=pl.BlockSpec((1, tb), lambda i: (0, i)),
        ),
        compiler_params=pltpu.CompilerParams(
            dimension_semantics=("parallel",)),
    )(xt, w1t, b1c, w2t, b2c, w3c, b3c)

    return out[0, :n].reshape(n, 1)


def init_params(key):
    """Deterministic init mirroring PyTorch Linear shapes (stored as (in,out))."""
    ks = jax.random.split(key, 6)

    def linear(kw, kb, fan_in, fan_out):
        bound = 1.0 / jnp.sqrt(fan_in)
        w = jax.random.uniform(kw, (fan_in, fan_out), jnp.float32, -bound, bound)
        b = jax.random.uniform(kb, (1, fan_out), jnp.float32, -bound, bound)
        return w, b

    w1, b1 = linear(ks[0], ks[1], 12, 64)
    w2, b2 = linear(ks[2], ks[3], 64, 32)
    w3, b3 = linear(ks[4], ks[5], 32, 1)
    return (w1, b1, w2, b2, w3, b3)


def reference_forward(x, params):
    """Plain-JAX reference for correctness check."""
    w1, b1, w2, b2, w3, b3 = params
    h = x.reshape(x.shape[0], -1)
    h = jax.nn.sigmoid(h @ w1 + b1)
    h = jax.nn.sigmoid(h @ w2 + b2)
    return h @ w3 + b3


if __name__ == "__main__":
    key = jax.random.PRNGKey(0)
    k_param, k_x = jax.random.split(key)
    params = init_params(k_param)
    x = jax.random.normal(k_x, (2, 3, 4), jnp.float32)  # flattens to (2, 12)

    out = jax.block_until_ready(simple_dnn_forward(x, params))
    ref = reference_forward(x, params)
    assert out.shape == (2, 1), out.shape
    assert jnp.allclose(out, ref, atol=1e-5, rtol=1e-5), (out, ref)
    print("KERNEL_OK")
</pallas_src>

<mosaic_0001>
module attributes {stable_mosaic.version = 11 : i64} {
  func.func @mlp_kernel(%arg0: i32, %arg1: memref<12x128xf32, #tpu.memory_space<vmem>>, %arg2: memref<64x12xf32, #tpu.memory_space<vmem>>, %arg3: memref<64x1xf32, #tpu.memory_space<vmem>>, %arg4: memref<32x64xf32, #tpu.memory_space<vmem>>, %arg5: memref<32x1xf32, #tpu.memory_space<vmem>>, %arg6: memref<32x1xf32, #tpu.memory_space<vmem>>, %arg7: memref<1x1xf32, #tpu.memory_space<vmem>>, %arg8: memref<1x128xf32, #tpu.memory_space<vmem>>) attributes {dimension_semantics = [#tpu.dimension_semantics<parallel>], iteration_bounds = array<i64: 1>, scalar_prefetch = 0 : i64, scratch_operands = 0 : i64, tpu.core_type = #tpu.core_type<tc>, window_params = [{transform_indices = @transform_0, window_bounds = array<i64: 12, 128>}, {pipeline_mode = #tpu.pipeline_mode<synchronous>, transform_indices = @transform_1, window_bounds = array<i64: 64, 12>}, {pipeline_mode = #tpu.pipeline_mode<synchronous>, transform_indices = @transform_2, window_bounds = array<i64: 64, 1>}, {pipeline_mode = #tpu.pipeline_mode<synchronous>, transform_indices = @transform_3, window_bounds = array<i64: 32, 64>}, {pipeline_mode = #tpu.pipeline_mode<synchronous>, transform_indices = @transform_4, window_bounds = array<i64: 32, 1>}, {pipeline_mode = #tpu.pipeline_mode<synchronous>, transform_indices = @transform_5, window_bounds = array<i64: 32, 1>}, {pipeline_mode = #tpu.pipeline_mode<synchronous>, transform_indices = @transform_6, window_bounds = array<i64: 1, 1>}, {transform_indices = @transform_7, window_bounds = array<i64: 1, 128>}]} {
    %c0 = arith.constant 0 : index
    %c0_0 = arith.constant 0 : index
    %0 = vector.load %arg2[%c0, %c0_0] : memref<64x12xf32, #tpu.memory_space<vmem>>, vector<64x12xf32>
    %c0_1 = arith.constant 0 : index
    %c0_2 = arith.constant 0 : index
    %1 = vector.load %arg1[%c0_1, %c0_2] : memref<12x128xf32, #tpu.memory_space<vmem>>, vector<12x128xf32>
    %cst = arith.constant dense<0.000000e+00> : vector<64x128xf32>
    %2 = tpu.matmul %0, %1, %cst {dimension_numbers = #tpu.dot_dimension_numbers<[1], [0], [0], [1], [0, 0, 1, 1], [], []>} : vector<64x12xf32>, vector<12x128xf32>, vector<64x128xf32> -> vector<64x128xf32>
    %c0_3 = arith.constant 0 : index
    %c0_4 = arith.constant 0 : index
    %3 = vector.load %arg3[%c0_3, %c0_4] : memref<64x1xf32, #tpu.memory_space<vmem>>, vector<64x1xf32>
    %4 = vector.broadcast %3 : vector<64x1xf32> to vector<64x128xf32>
    %5 = arith.addf %2, %4 : vector<64x128xf32>
    %6 = arith.negf %5 : vector<64x128xf32>
    %7 = math.exp %6 : vector<64x128xf32>
    %cst_5 = arith.constant 1.000000e+00 : f32
    %8 = vector.broadcast %cst_5 : f32 to vector<64x128xf32>
    %9 = arith.addf %8, %7 : vector<64x128xf32>
    %10 = arith.divf %8, %9 : vector<64x128xf32>
    %c0_6 = arith.constant 0 : index
    %c0_7 = arith.constant 0 : index
    %11 = vector.load %arg4[%c0_6, %c0_7] : memref<32x64xf32, #tpu.memory_space<vmem>>, vector<32x64xf32>
    %cst_8 = arith.constant dense<0.000000e+00> : vector<32x128xf32>
    %12 = tpu.matmul %11, %10, %cst_8 {dimension_numbers = #tpu.dot_dimension_numbers<[1], [0], [0], [1], [0, 0, 1, 1], [], []>} : vector<32x64xf32>, vector<64x128xf32>, vector<32x128xf32> -> vector<32x128xf32>
    %c0_9 = arith.constant 0 : index
    %c0_10 = arith.constant 0 : index
    %13 = vector.load %arg5[%c0_9, %c0_10] : memref<32x1xf32, #tpu.memory_space<vmem>>, vector<32x1xf32>
    %14 = vector.broadcast %13 : vector<32x1xf32> to vector<32x128xf32>
    %15 = arith.addf %12, %14 : vector<32x128xf32>
    %16 = arith.negf %15 : vector<32x128xf32>
    %17 = math.exp %16 : vector<32x128xf32>
    %cst_11 = arith.constant 1.000000e+00 : f32
    %18 = vector.broadcast %cst_11 : f32 to vector<32x128xf32>
    %19 = arith.addf %18, %17 : vector<32x128xf32>
    %20 = arith.divf %18, %19 : vector<32x128xf32>
    %c0_12 = arith.constant 0 : index
    %c0_13 = arith.constant 0 : index
    %21 = vector.load %arg6[%c0_12, %c0_13] : memref<32x1xf32, #tpu.memory_space<vmem>>, vector<32x1xf32>
    %22 = vector.broadcast %21 : vector<32x1xf32> to vector<32x128xf32>
    %23 = arith.mulf %20, %22 : vector<32x128xf32>
    %cst_14 = arith.constant dense<0.000000e+00> : vector<128xf32>
    %24 = vector.multi_reduction <add>, %23, %cst_14 [0] : vector<32x128xf32> to vector<128xf32>
    %25 = vector.shape_cast %24 : vector<128xf32> to vector<1x128xf32>
    %c0_15 = arith.constant 0 : index
    %c0_16 = arith.constant 0 : index
    %26 = vector.load %arg7[%c0_15, %c0_16] : memref<1x1xf32, #tpu.memory_space<vmem>>, vector<1x1xf32>
    %27 = vector.broadcast %26 : vector<1x1xf32> to vector<1x128xf32>
    %28 = arith.addf %25, %27 : vector<1x128xf32>
    %c0_17 = arith.constant 0 : index
    %c0_18 = arith.constant 0 : index
    %29 = vector.load %arg8[%c0_17, %c0_18] : memref<1x128xf32, #tpu.memory_space<vmem>>, vector<1x128xf32>
    tpu.vector_store %arg8[%c0_17, %c0_18], %28 {strides = array<i32>} : memref<1x128xf32, #tpu.memory_space<vmem>>, vector<1x128xf32>,
    return
  }
  func.func @transform_0(%arg0: i32) -> (i32, i32) {
    %c0_i32 = arith.constant 0 : i32
    %c0_i32_0 = arith.constant 0 : i32
    return %c0_i32, %arg0 : i32, i32
  }
  func.func @transform_1(%arg0: i32) -> (i32, i32) {
    %c0_i32 = arith.constant 0 : i32
    %c0_i32_0 = arith.constant 0 : i32
    %c0_i32_1 = arith.constant 0 : i32
    return %c0_i32, %c0_i32_0 : i32, i32
  }
  func.func @transform_2(%arg0: i32) -> (i32, i32) {
    %c0_i32 = arith.constant 0 : i32
    %c0_i32_0 = arith.constant 0 : i32
    %c0_i32_1 = arith.constant 0 : i32
    return %c0_i32, %c0_i32_0 : i32, i32
  }
  func.func @transform_3(%arg0: i32) -> (i32, i32) {
    %c0_i32 = arith.constant 0 : i32
    %c0_i32_0 = arith.constant 0 : i32
    %c0_i32_1 = arith.constant 0 : i32
    return %c0_i32, %c0_i32_0 : i32, i32
  }
  func.func @transform_4(%arg0: i32) -> (i32, i32) {
    %c0_i32 = arith.constant 0 : i32
    %c0_i32_0 = arith.constant 0 : i32
    %c0_i32_1 = arith.constant 0 : i32
    return %c0_i32, %c0_i32_0 : i32, i32
  }
  func.func @transform_5(%arg0: i32) -> (i32, i32) {
    %c0_i32 = arith.constant 0 : i32
    %c0_i32_0 = arith.constant 0 : i32
    %c0_i32_1 = arith.constant 0 : i32
    return %c0_i32, %c0_i32_0 : i32, i32
  }
  func.func @transform_6(%arg0: i32) -> (i32, i32) {
    %c0_i32 = arith.constant 0 : i32
    %c0_i32_0 = arith.constant 0 : i32
    %c0_i32_1 = arith.constant 0 : i32
    return %c0_i32, %c0_i32_0 : i32, i32
  }
  func.func @transform_7(%arg0: i32) -> (i32, i32) {
    %c0_i32 = arith.constant 0 : i32
    %c0_i32_0 = arith.constant 0 : i32
    return %c0_i32, %arg0 : i32, i32
  }
}

</mosaic_0001>

<bundles_post_ra>
// kernel: tpu_custom_call.1
= control target key start
LH: loop header
LB: loop body
LE: loop exit
PB: predicated region body
PF: predicated region fallthrough
CT: control target
= control target key end

     0   :  { %s972_s0 = inlined_call_operand.vmem [shape: f32[12,128], index: 0, kind: input, shape index: {}]   ;;  %s973_s1 = inlined_call_operand.vmem [shape: f32[64,12], index: 1, kind: input, shape index: {}]   ;;  %s974_s2 = inlined_call_operand.vmem [shape: f32[64,1], index: 2, kind: input, shape index: {}]   ;;  %s975_s3 = inlined_call_operand.vmem [shape: f32[32,64], index: 3, kind: input, shape index: {}]   ;;  %s976_s4 = inlined_call_operand.vmem [shape: f32[32,1], index: 4, kind: input, shape index: {}]   ;;  %s977_s5 = inlined_call_operand.vmem [shape: f32[32,1], index: 5, kind: input, shape index: {}]   ;;  %s978_s6 = inlined_call_operand.<no memory space> [shape: f32[1,1], index: 6, kind: input, shape index: {}]   ;;  %s979_s7 = inlined_call_operand.hbm [shape: f32[1,128], index: 7, kind: output, shape index: {}]  }
   0x1   :  { %v12_v0 = vstv %s978_s6 }
   0x2   :  { %13 = vst [vmem:[#allocation2] sm:$0x1] %v12_v0 }
   0x3   :  { %v38_v1 = vld [vmem:[%s972_s0 + $0x8] sm:$0xf]  ;;  %vm112_vm0 = vcmask 1043456   ;;  %v46_v2 = vld [vmem:[%s974_s2 + $0x38] sm:$0xff]  ;;  %v631_v4 = vmov 0   ;;  %v37_v5 = vld [vmem:[%s972_s0] sm:$0xff] }
   0x4   :  { %v44_v3 = vld [vmem:[%s974_s2 + $0x28] sm:$0xff]  ;;  %555 = vset.pattern.permute.xlu1 %v631_v4  ;;  %554 = vset.pattern.permute.xlu0 %v631_v4  ;;  %v29_v6 = vld [vmem:[%s973_s1] sm:$0xff]  ;;  %vm87_vm1 = vcmask 97280   ;;  %v42_v8 = vld [vmem:[%s974_s2 + $0x18] sm:$0xff] }
   0x5   :  { %517 = vmatpush.msk.msra.mxu0 %vm112_vm0, %v38_v1  ;;  %542 = vmatpush.msk.msra.mxu2 %vm112_vm0, %v38_v1  ;;  %v33_v7 = vld [vmem:[%s973_s1 + $0x20] sm:$0xff] }
   0x6   :  { %84 = vperm.xlu0 %554, %v46_v2   ;;  %74 = vperm.xlu1 %555, %v44_v3  }
   0x7   :  { %131 = vmatpush.msra.mxu0 %v37_v5  ;;  %543 = vmatpush.msra.mxu2 %v37_v5 }
   0x8   :  { %518 = vmatmul.msk.f32.vlgmr.msra.gmra.mxu0 %vm87_vm1, %v29_v6  ;;  %522 = vmatmul.msk.f32.vlgmr.msra.gmra.mxu2 %vm87_vm1, %v33_v7 }
   0x9   :  { %556 = vset.pattern.permute.xlu2 %v631_v4 }
   0xa   :  { %64 = vperm.xlu2 %556, %v42_v8  }
   0xb   :  { %14 = vsyncpa [#allocation4], 0  ;;  %v45_v9 = vld [vmem:[%s974_s2 + $0x30] sm:$0xff]  ;;  %v43_v10 = vld [vmem:[%s974_s2 + $0x20] sm:$0xff] }
   0xc   :  { %v30_v11 = vld [vmem:[%s973_s1 + $0x8] sm:$0xff]  ;;  %v41_v13 = vld [vmem:[%s974_s2 + $0x10] sm:$0xff]  ;;  %v39_v15 = vld [vmem:[%s974_s2] sm:$0xff] }
   0xd   :  { %v34_v12 = vld [vmem:[%s973_s1 + $0x28] sm:$0xff]  ;;  %v31_v16 = vld [vmem:[%s973_s1 + $0x10] sm:$0xff]  ;;  %v313_v18 = vld [vmem:[%s976_s4] sm:$0xff] }
   0xe   :  { %79 = vperm.xlu0 %554, %v45_v9   ;;  %69 = vperm.xlu1 %555, %v43_v10   ;;  %v40_v14 = vld [vmem:[%s974_s2 + $0x8] sm:$0xff]  ;;  %v35_v17 = vld [vmem:[%s973_s1 + $0x30] sm:$0xff]  ;;  %v32_v21 = vld [vmem:[%s973_s1 + $0x18] sm:$0xff]  ;;  %s508_s2 = sshll.u32 %s979_s7, 4  ;;  %s509_s2 = int_to_ptr.hbm [resolvable:$true] %s508_s2 }
   0xf   :  { %v314_v19 = vld [vmem:[%s976_s4 + $0x8] sm:$0xff]  ;;  %v315_v20 = vld [vmem:[%s976_s4 + $0x10] sm:$0xff]  ;;  %v36_v22 = vld [vmem:[%s973_s1 + $0x38] sm:$0xff] }
  0x10   :  { %519 = vmatmul.msk.f32.gmra.mxu0 %vm87_vm1, %v30_v11  ;;  %523 = vmatmul.msk.f32.gmra.mxu2 %vm87_vm1, %v34_v12  ;;  %v316_v23 = vld [vmem:[%s976_s4 + $0x18] sm:$0xff]  ;;  %v455_v24 = vld [vmem:[%s977_s5] sm:$0xff]  ;;  %v456_v25 = vld [vmem:[%s977_s5 + $0x8] sm:$0xff] }
  0x11   :  { %v457_v26 = vld [vmem:[%s977_s5 + $0x10] sm:$0xff]  ;;  %v458_v27 = vld [vmem:[%s977_s5 + $0x18] sm:$0xff]  ;;  %v492_v28 = vld [vmem:[#allocation2] sm:$0x1] }
  0x12   :  { %59 = vperm.xlu2 %556, %v41_v13  }
  0x16   :  { %54 = vperm.xlu0 %554, %v40_v14   ;;  %49 = vperm.xlu1 %555, %v39_v15  }
  0x18   :  { %520 = vmatmul.msk.f32.gmra.mxu0 %vm87_vm1, %v31_v16  ;;  %524 = vmatmul.msk.f32.gmra.mxu2 %vm87_vm1, %v35_v17 }
  0x1a   :  { %319 = vperm.xlu2 %556, %v313_v18  }
  0x1e   :  { %324 = vperm.xlu0 %554, %v314_v19   ;;  %329 = vperm.xlu1 %555, %v315_v20  }
  0x20   :  { %521 = vmatmul.msk.f32.gmra.mxu0 %vm87_vm1, %v32_v21  ;;  %525 = vmatmul.msk.f32.gmra.mxu2 %vm87_vm1, %v36_v22 }
  0x22   :  { %334 = vperm.xlu2 %556, %v316_v23  }
  0x26   :  { %461 = vperm.xlu0 %554, %v455_v24   ;;  %466 = vperm.xlu1 %555, %v456_v25  }
  0x2a   :  { %471 = vperm.xlu2 %556, %v457_v26  }
  0x2e   :  { %476 = vperm.xlu0 %554, %v458_v27   ;;  %495 = vperm.xlu1 %555, %v492_v28  }
  0x64   :  { %v65_v35 = vpop.permute.xlu2 %64 }
  0x6c   :  { %v60_v45 = vpop.permute.xlu2 %59 }
  0x78   :  { %v75_v29 = vpop.permute.xlu1 %74  ;;  %v85_v31 = vpop.permute.xlu0 %84 }
  0x80   :  { %v70_v32 = vpop.permute.xlu1 %69  ;;  %v80_v36 = vpop.permute.xlu0 %79 }
  0x85   :  { %v133_v30 = vpop.f32.mrf.mxu0 }
  0x88   :  { %v50_v38 = vpop.permute.xlu1 %49  ;;  %v55_v48 = vpop.permute.xlu0 %54 }
  0x89   :  { %v134_v41 = vadd.f32 %v133_v30, %v50_v38 }
  0x8b   :  { %v145_v33 = vpop.f32.mrf.mxu2  ;;  %v526_v46 = vmul.f32 -1.442695, %v134_v41 }
  0x8c   :  { %v146_v37 = vadd.f32 %v145_v33, %v70_v32 }
  0x8d   :  { %v136_v34 = vpop.f32.mrf.mxu0 }
  0x8e   :  { %v530_v42 = vmul.f32 -1.442695, %v146_v37  ;;  %v137_v49 = vadd.f32 %v136_v34, %v55_v48 }
  0x90   :  { %557 = vpow2.f32 %v530_v42  ;;  %v527_v57 = vmul.f32 -1.442695, %v137_v49 }
  0x93   :  { %v148_v39 = vpop.f32.mrf.mxu2 }
  0x94   :  { %v149_v40 = vadd.f32 %v148_v39, %v75_v29 }
  0x95   :  { %v139_v43 = vpop.f32.mrf.mxu0 }
  0x96   :  { %v531_v44 = vmul.f32 -1.442695, %v149_v40  ;;  %v140_v47 = vadd.f32 %v139_v43, %v60_v45  ;;  %v558_v56 = vpop.eup %557 }
  0x97   :  { %v762_v60 = vadd.f32 1.0, %v558_v56 }
  0x98   :  { %559 = vpow2.f32 %v531_v44  ;;  %v528_v52 = vmul.f32 -1.442695, %v140_v47 }
  0x99   :  { %561 = vpow2.f32 %v526_v46  ;;  %v258_v29 = vand.u32 2147483647, %v762_v60  ;;  %v260_v30 = vand.u32 2147483648, %v762_v60  ;;  %vm254_vm5 = vweird.f32 %v762_v60 }
  0x9b   :  { %v151_v50 = vpop.f32.mrf.mxu2 }
  0x9c   :  { %v152_v51 = vadd.f32 %v151_v50, %v80_v36 }
  0x9d   :  { %v142_v53 = vpop.f32.mrf.mxu0 }
  0x9e   :  { %v532_v54 = vmul.f32 -1.442695, %v152_v51  ;;  %v143_v55 = vadd.f32 %v142_v53, %v65_v35  ;;  %v560_v58 = vpop.eup %559 }
  0x9f   :  { %v562_v61 = vpop.eup %561  ;;  %v764_v62 = vadd.f32 1.0, %v560_v58 }
  0xa0   :  { %563 = vpow2.f32 %v532_v54  ;;  %v529_v59 = vmul.f32 -1.442695, %v143_v55  ;;  %v766_v2 = vadd.f32 1.0, %v562_v61 }
  0xa1   :  { %565 = vpow2.f32 %v528_v52  ;;  %vm269_vm2 = vweird.f32 %v764_v62  ;;  %v273_v35 = vand.u32 2147483647, %v764_v62  ;;  %v275_v36 = vand.u32 2147483648, %v764_v62 }
  0xa2   :  { %567 = vpow2.f32 %v529_v59  ;;  %vm194_vm1 = vweird.f32 %v766_v2 }
  0xa3   :  { %569 = vpow2.f32 %v527_v57  ;;  %v154_v63 = vpop.f32.mrf.mxu2  ;;  %vm844_vm15 = vcmp.eq.f32.partialorder %v273_v35, 8.507059e+37 }
  0xa4   :  { %v155_v0 = vadd.f32 %v154_v63, %v85_v31  ;;  %571 = vrcp.f32 %v762_v60 }
  0xa5   :  { %573 = vrcp.f32 %v764_v62 }
  0xa6   :  { %v564_v1 = vpop.eup %563  ;;  %v533_v3 = vmul.f32 -1.442695, %v155_v0 }
  0xa7   :  { %v566_v4 = vpop.eup %565  ;;  %v770_v5 = vadd.f32 1.0, %v564_v1 }
  0xa8   :  { %v568_v6 = vpop.eup %567  ;;  %575 = vpow2.f32 %v533_v3  ;;  %v776_v9 = vadd.f32 1.0, %v566_v4 }
  0xa9   :  { %v570_v7 = vpop.eup %569  ;;  %577 = vrcp.f32 %v770_v5  ;;  %v773_v8 = vadd.f32 1.0, %v568_v6  ;;  %v288_v45 = vand.u32 2147483647, %v770_v5  ;;  %vm284_vm9 = vweird.f32 %v770_v5 }
  0xaa   :  { %579 = vrcp.f32 %v766_v2  ;;  %v778_v10 = vpop.eup %571  ;;  %v780_v11 = vadd.f32 1.0, %v570_v7  ;;  %vm224_vm4 = vweird.f32 %v776_v9  ;;  %v228_v37 = vand.u32 2147483647, %v776_v9 }
  0xab   :  { %v782_v12 = vpop.eup %573  ;;  %581 = vrcp.f32 %v773_v8  ;;  %v250_v19 = vmul.f32 %v778_v10, %v762_v60  ;;  %vm255_vm3 = vweird.f32 %v778_v10  ;;  %v230_v38 = vand.u32 2147483648, %v776_v9 }
  0xac   :  { %583 = vrcp.f32 %v776_v9  ;;  %v265_v18 = vmul.f32 %v782_v12, %v764_v62  ;;  %vm209_vm8 = vweird.f32 %v780_v11  ;;  %v290_v50 = vand.u32 2147483648, %v770_v5 }
  0xad   :  { %585 = vrcp.f32 %v780_v11  ;;  %v251_v26 = vsub.f32 1.0, %v250_v19  ;;  %vm270_vm10 = vweird.f32 %v782_v12  ;;  %vm840_vm14 = vcmp.eq.f32.partialorder %v288_v45, 8.507059e+37  ;;  %v325_v45 = vpop.permute.xlu0 %324 }
  0xae   :  { %v576_v13 = vpop.eup %575  ;;  %v266_v25 = vsub.f32 1.0, %v265_v18  ;;  %v291_v3 = vor.u32 1.1754944e-38, %v290_v50  ;;  %v330_v50 = vpop.permute.xlu1 %329 }
  0xaf   :  { %v786_v14 = vpop.eup %577  ;;  %v188_v15 = vadd.f32 1.0, %v576_v13  ;;  %v252_v42 = vmul.f32 %v778_v10, %v251_v26  ;;  %v276_v13 = vor.u32 1.1754944e-38, %v275_v36  ;;  %v198_v36 = vand.u32 2147483647, %v766_v2 }
  0xb0   :  { %v788_v16 = vpop.eup %579  ;;  %v280_v17 = vmul.f32 %v786_v14, %v770_v5  ;;  %v267_v41 = vmul.f32 %v782_v12, %v266_v25  ;;  %vm285_vm6 = vweird.f32 %v786_v14 }
  0xb1   :  { %587 = vrcp.f32 %v188_v15  ;;  %v797_v20 = vpop.eup %581  ;;  %v801_v21 = vmul.f32 %v788_v16, %v766_v2  ;;  %v305_v44 = vand.u32 2147483648, %v188_v15  ;;  %v303_v48 = vand.u32 2147483647, %v188_v15  ;;  %vm834_vm12 = vmor %vm284_vm9, %vm285_vm6 }
  0xb2   :  { %v803_v22 = vpop.eup %583  ;;  %v281_v23 = vsub.f32 1.0, %v280_v17  ;;  %v235_v27 = vmul.f32 %v797_v20, %v773_v8  ;;  %vm299_vm11 = vweird.f32 %v188_v15  ;;  %v268_v54 = vadd.f32 %v782_v12, %v267_v41  ;;  %vm858_vm6 = vmor %vm269_vm2, %vm270_vm10  ;;  %v320_v41 = vpop.permute.xlu2 %319 }
  0xb3   :  { %v805_v24 = vpop.eup %585  ;;  %v220_v31 = vmul.f32 %v803_v22, %v776_v9  ;;  %v191_v32 = vsub.f32 1.0, %v801_v21  ;;  %v306_v56 = vor.u32 1.1754944e-38, %v305_v44  ;;  %v253_v59 = vadd.f32 %v778_v10, %v252_v42  ;;  %vm876_vm2 = vmor %vm254_vm5, %vm255_vm3 }
  0xb4   :  { %v282_v34 = vmul.f32 %v786_v14, %v281_v23  ;;  %v205_v39 = vmul.f32 %v805_v24, %v780_v11  ;;  %v236_v43 = vsub.f32 1.0, %v235_v27  ;;  %vm304_vm0 = vcmp.eq.f32.partialorder %v303_v48, 8.507059e+37 }
  0xb5   :  { %v221_v46 = vsub.f32 1.0, %v220_v31  ;;  %vm225_vm9 = vweird.f32 %v803_v22  ;;  %v272_v5 = vsel %vm858_vm6, %v782_v12, %v268_v54  ;;  %v245_v12 = vand.u32 2147483648, %v773_v8 }
  0xb6   :  { %v283_v49 = vadd.f32 %v786_v14, %v282_v34  ;;  %v206_v51 = vsub.f32 1.0, %v205_v39  ;;  %v237_v55 = vmul.f32 %v797_v20, %v236_v43  ;;  %vm210_vm10 = vweird.f32 %v805_v24  ;;  %vm891_vm3 = vmor %vm224_vm4, %vm225_vm9  ;;  %v310_v39 = vld [vmem:[%s975_s3 + $0x8] sm:$0xff] }
  0xb7   :  { %v588_v28 = vpop.eup %587  ;;  %v222_v0 = vmul.f32 %v803_v22, %v221_v46  ;;  %v243_v17 = vand.u32 2147483647, %v773_v8  ;;  %v192_v23 = vmul.f32 %v788_v16, %v191_v32  ;;  %v277_v25 = vsel %vm844_vm15, %v276_v13, %v272_v5 }
  0xb8   :  { %v295_v33 = vmul.f32 %v588_v28, %v188_v15  ;;  %vm300_vm7 = vweird.f32 %v588_v28  ;;  %v287_v63 = vsel %vm834_vm12, %v786_v14, %v283_v49  ;;  %v238_v6 = vadd.f32 %v797_v20, %v237_v55  ;;  %vm925_vm12 = vmor %vm209_vm8, %vm210_vm10 }
  0xb9   :  { %vm301_vm13 = vmor %vm299_vm11, %vm300_vm7  ;;  %vm239_vm7 = vweird.f32 %v773_v8  ;;  %vm240_vm11 = vweird.f32 %v797_v20  ;;  %v207_v62 = vmul.f32 %v805_v24, %v206_v51  ;;  %v292_v7 = vsel %vm840_vm14, %v291_v3, %v287_v63 }
  0xba   :  { %v296_v40 = vsub.f32 1.0, %v295_v33  ;;  %v257_v15 = vsel %vm876_vm2, %v778_v10, %v253_v59  ;;  %v223_v18 = vadd.f32 %v803_v22, %v222_v0  ;;  %v261_v10 = vor.u32 1.1754944e-38, %v260_v30  ;;  %vm906_vm5 = vmor %vm239_vm7, %vm240_vm11  ;;  %v335_v57 = vpop.permute.xlu2 %334 }
  0xbb   :  { %v215_v27 = vand.u32 2147483648, %v780_v11  ;;  %v200_v21 = vand.u32 2147483648, %v766_v2  ;;  %vm259_vm4 = vcmp.eq.f32.partialorder %v258_v29, 8.507059e+37  ;;  %v208_v30 = vadd.f32 %v805_v24, %v207_v62 }
  0xbc   :  { %v297_v47 = vmul.f32 %v588_v28, %v296_v40  ;;  %v213_v8 = vand.u32 2147483647, %v780_v11  ;;  %v262_v31 = vsel %vm259_vm4, %v261_v10, %v257_v15  ;;  %v246_v32 = vor.u32 1.1754944e-38, %v245_v12  ;;  %v312_v40 = vld [vmem:[%s975_s3 + $0x18] sm:$0xff] }
  0xbd   :  { %v231_v33 = vor.u32 1.1754944e-38, %v230_v38  ;;  %vm244_vm14 = vcmp.eq.f32.partialorder %v243_v17, 8.507059e+37  ;;  %vm229_vm15 = vcmp.eq.f32.partialorder %v228_v37, 8.507059e+37  ;;  %v193_v29 = vadd.f32 %v788_v16, %v192_v23 }
  0xbe   :  { %v298_v52 = vadd.f32 %v588_v28, %v297_v47  ;;  %v216_v11 = vor.u32 1.1754944e-38, %v215_v27  ;;  %v212_v35 = vsel %vm925_vm12, %v805_v24, %v208_v30  ;;  %vm214_vm8 = vcmp.eq.f32.partialorder %v213_v8, 8.507059e+37  ;;  %v309_v24 = vld [vmem:[%s975_s3] sm:$0xff] }
  0xbf   :  { %v201_v9 = vor.u32 1.1754944e-38, %v200_v21  ;;  %vm199_vm6 = vcmp.eq.f32.partialorder %v198_v36, 8.507059e+37  ;;  %vm337_vm7 = vcmask 523264  }
  0xc0   :  { %v302_v61 = vsel %vm301_vm13, %v588_v28, %v298_v52  ;;  %v242_v28 = vsel %vm906_vm5, %v797_v20, %v238_v6  ;;  %vm195_vm13 = vweird.f32 %v788_v16  ;;  %v227_v20 = vsel %vm891_vm3, %v803_v22, %v223_v18 }
  0xc1   :  { %v307_v1 = vsel %vm304_vm0, %v306_v56, %v302_v61  ;;  %v247_v34 = vsel %vm244_vm14, %v246_v32, %v242_v28  ;;  %v232_v38 = vsel %vm229_vm15, %v231_v33, %v227_v20  ;;  %vm196_vm0 = vmor %vm194_vm1, %vm195_vm13  ;;  %v217_v37 = vsel %vm214_vm8, %v216_v11, %v212_v35  ;;  %v462_v20 = vpop.permute.xlu0 %461 }
  0xc2   :  { %358 = vmatpush.msra.mxu1 %v307_v1  ;;  %544 = vmatpush.msra.mxu3 %v307_v1  ;;  %v197_v22 = vsel %vm196_vm0, %v788_v16, %v193_v29  ;;  %v311_v16 = vld [vmem:[%s975_s3 + $0x10] sm:$0xff]  ;;  %s632_s3 = smov [#allocation3]  }
  0xc3   :  { %v202_v2 = vsel %vm199_vm6, %v201_v9, %v197_v22  ;;  %s506_s9 = sshll.u32 %s632_s3, 4  ;;  %s507_s9 = int_to_ptr.vmem [resolvable:$true] %s506_s9 }
  0xc4   :  { %359 = vmatpush.msra.mxu1 %v292_v7  ;;  %545 = vmatpush.msra.mxu3 %v292_v7 }
  0xc6   :  { %360 = vmatpush.msra.mxu1 %v277_v25  ;;  %546 = vmatpush.msra.mxu3 %v277_v25 }
  0xc8   :  { %361 = vmatpush.msra.mxu1 %v262_v31  ;;  %547 = vmatpush.msra.mxu3 %v262_v31 }
  0xca   :  { %362 = vmatpush.msra.mxu1 %v247_v34  ;;  %548 = vmatpush.msra.mxu3 %v247_v34 }
  0xcc   :  { %363 = vmatpush.msra.mxu1 %v232_v38  ;;  %549 = vmatpush.msra.mxu3 %v232_v38 }
  0xce   :  { %364 = vmatpush.msra.mxu1 %v217_v37  ;;  %550 = vmatpush.msra.mxu3 %v217_v37  ;;  %v467_v37 = vpop.permute.xlu1 %466 }
  0xd0   :  { %365 = vmatpush.msra.mxu1 %v202_v2  ;;  %551 = vmatpush.msra.mxu3 %v202_v2 }
  0xd1   :  { %534 = vmatmul.msk.f32.vlgmr.msra.gmra.mxu1 %vm337_vm7, %v309_v24  ;;  %535 = vmatmul.msk.f32.vlgmr.msra.gmra.mxu3 %vm337_vm7, %v310_v39 }
  0xd9   :  { %536 = vmatmul.msk.f32.gmra.mxu3 %vm337_vm7, %v311_v16 }
  0xe1   :  { %537 = vmatmul.msk.f32.gmra.mxu3 %vm337_vm7, %v312_v40 }
 0x14e   :  { %v367_v42 = vpop.f32.mrf.mxu1 }
 0x14f   :  { %v368_v43 = vadd.f32 %v367_v42, %v320_v41  ;;  %v472_v42 = vpop.permute.xlu2 %471 }
 0x151   :  { %v538_v44 = vmul.f32 -1.442695, %v368_v43 }
 0x153   :  { %589 = vpow2.f32 %v538_v44 }
 0x154   :  { %v370_v46 = vpop.f32.mrf.mxu3 }
 0x155   :  { %v371_v47 = vadd.f32 %v370_v46, %v325_v45 }
 0x157   :  { %v539_v48 = vmul.f32 -1.442695, %v371_v47 }
 0x159   :  { %v590_v49 = vpop.eup %589  ;;  %591 = vpow2.f32 %v539_v48 }
 0x15a   :  { %v391_v51 = vadd.f32 1.0, %v590_v49  ;;  %v477_v49 = vpop.permute.xlu0 %476 }
 0x15c   :  { %v373_v52 = vpop.f32.mrf.mxu3  ;;  %593 = vrcp.f32 %v391_v51  ;;  %vm400_vm10 = vweird.f32 %v391_v51  ;;  %v404_v27 = vand.u32 2147483647, %v391_v51  ;;  %v406_v21 = vand.u32 2147483648, %v391_v51 }
 0x15d   :  { %v374_v53 = vadd.f32 %v373_v52, %v330_v50 }
 0x15e   :  { %v407_v36 = vor.u32 1.1754944e-38, %v406_v21  ;;  %vm405_vm14 = vcmp.eq.f32.partialorder %v404_v27, 8.507059e+37 }
 0x15f   :  { %v592_v54 = vpop.eup %591  ;;  %v540_v55 = vmul.f32 -1.442695, %v374_v53 }
 0x160   :  { %v392_v56 = vadd.f32 1.0, %v592_v54 }
 0x161   :  { %595 = vpow2.f32 %v540_v55 }
 0x162   :  { %597 = vrcp.f32 %v392_v56  ;;  %v594_v61 = vpop.eup %593  ;;  %vm415_vm11 = vweird.f32 %v392_v56  ;;  %v421_v23 = vand.u32 2147483648, %v392_v56  ;;  %v419_v10 = vand.u32 2147483647, %v392_v56 }
 0x163   :  { %v396_v4 = vmul.f32 %v594_v61, %v391_v51  ;;  %vm401_vm9 = vweird.f32 %v594_v61 }
 0x164   :  { %v376_v58 = vpop.f32.mrf.mxu3  ;;  %vm961_vm5 = vmor %vm400_vm10, %vm401_vm9  ;;  %v422_v29 = vor.u32 1.1754944e-38, %v421_v23  ;;  %vm420_vm13 = vcmp.eq.f32.partialorder %v419_v10, 8.507059e+37 }
 0x165   :  { %v377_v59 = vadd.f32 %v376_v58, %v335_v57  ;;  %v397_v62 = vsub.f32 1.0, %v396_v4  ;;  %v496_v58 = vpop.permute.xlu1 %495 }
 0x167   :  { %v596_v63 = vpop.eup %595  ;;  %v541_v0 = vmul.f32 -1.442695, %v377_v59  ;;  %v398_v15 = vmul.f32 %v594_v61, %v397_v62 }
 0x168   :  { %v598_v1 = vpop.eup %597  ;;  %v393_v3 = vadd.f32 1.0, %v596_v63 }
 0x169   :  { %v411_v5 = vmul.f32 %v598_v1, %v392_v56  ;;  %599 = vpow2.f32 %v541_v0  ;;  %vm416_vm1 = vweird.f32 %v598_v1  ;;  %v399_v25 = vadd.f32 %v594_v61, %v398_v15 }
 0x16a   :  { %601 = vrcp.f32 %v393_v3  ;;  %vm957_vm3 = vmor %vm415_vm11, %vm416_vm1  ;;  %v436_v30 = vand.u32 2147483648, %v393_v3  ;;  %vm430_vm4 = vweird.f32 %v393_v3  ;;  %v434_v33 = vand.u32 2147483647, %v393_v3 }
 0x16b   :  { %v412_v6 = vsub.f32 1.0, %v411_v5  ;;  %v403_v34 = vsel %vm961_vm5, %v594_v61, %v399_v25  ;;  %v498_v61 = vperm.slane %v496_v58, 0 }
 0x16c   :  { %v437_v9 = vor.u32 1.1754944e-38, %v436_v30  ;;  %vm435_vm15 = vcmp.eq.f32.partialorder %v434_v33, 8.507059e+37  ;;  %v408_v24 = vsel %vm405_vm14, %v407_v36, %v403_v34 }
 0x16d   :  { %v413_v13 = vmul.f32 %v598_v1, %v412_v6  ;;  %v479_v44 = vmul.f32 %v462_v20, %v408_v24 }
 0x16f   :  { %v600_v7 = vpop.eup %599  ;;  %v414_v18 = vadd.f32 %v598_v1, %v413_v13 }
 0x170   :  { %v602_v14 = vpop.eup %601  ;;  %v394_v12 = vadd.f32 1.0, %v600_v7 }
 0x171   :  { %v426_v17 = vmul.f32 %v602_v14, %v393_v3  ;;  %vm431_vm2 = vweird.f32 %v602_v14  ;;  %v418_v31 = vsel %vm957_vm3, %v598_v1, %v414_v18 }
 0x172   :  { %603 = vrcp.f32 %v394_v12  ;;  %vm432_vm12 = vmor %vm430_vm4, %vm431_vm2  ;;  %v423_v38 = vsel %vm420_vm13, %v422_v29, %v418_v31  ;;  %v451_v39 = vand.u32 2147483648, %v394_v12  ;;  %v449_v40 = vand.u32 2147483647, %v394_v12 }
 0x173   :  { %v427_v19 = vsub.f32 1.0, %v426_v17  ;;  %v480_v41 = vmul.f32 %v467_v37, %v423_v38  ;;  %vm445_vm0 = vweird.f32 %v394_v12 }
 0x174   :  { %v452_v46 = vor.u32 1.1754944e-38, %v451_v39  ;;  %vm450_vm7 = vcmp.eq.f32.partialorder %v449_v40, 8.507059e+37 }
 0x175   :  { %v428_v26 = vmul.f32 %v602_v14, %v427_v19  ;;  %v483_v48 = vadd.f32 %v480_v41, %v479_v44 }
 0x177   :  { %v429_v32 = vadd.f32 %v602_v14, %v428_v26 }
 0x178   :  { %v604_v60 = vpop.eup %603 }
 0x179   :  { %v433_v11 = vsel %vm432_vm12, %v602_v14, %v429_v32  ;;  %v441_v35 = vmul.f32 %v604_v60, %v394_v12  ;;  %vm446_vm8 = vweird.f32 %v604_v60 }
 0x17a   :  { %v438_v2 = vsel %vm435_vm15, %v437_v9, %v433_v11  ;;  %vm447_vm6 = vmor %vm445_vm0, %vm446_vm8 }
 0x17b   :  { %v442_v22 = vsub.f32 1.0, %v441_v35  ;;  %v481_v45 = vmul.f32 %v472_v42, %v438_v2 }
 0x17d   :  { %v443_v16 = vmul.f32 %v604_v60, %v442_v22  ;;  %v484_v52 = vadd.f32 %v483_v48, %v481_v45 }
 0x17f   :  { %v444_v43 = vadd.f32 %v604_v60, %v443_v16 }
 0x181   :  { %v448_v47 = vsel %vm447_vm6, %v604_v60, %v444_v43 }
 0x182   :  { %v453_v50 = vsel %vm450_vm7, %v452_v46, %v448_v47 }
 0x183   :  { %v482_v51 = vmul.f32 %v477_v49, %v453_v50 }
 0x185   :  { %v485_v53 = vadd.f32 %v484_v52, %v482_v51 }
 0x187   :  { %v486_v54 = vrot.slane %v485_v53, 4 }
 0x189   :  { %v487_v55 = vadd.f32 %v486_v54, %v485_v53 }
 0x18b   :  { %v488_v56 = vrot.slane %v487_v55, 2 }
 0x18d   :  { %v489_v57 = vadd.f32 %v488_v56, %v487_v55 }
 0x18f   :  { %v490_v59 = vrot.slane %v489_v57, 1 }
 0x191   :  { %v491_v63 = vadd.f32 %v490_v59, %v489_v57 }
 0x193   :  { %v499_v0 = vadd.f32 %v498_v61, %v491_v63 }
 0x195   :  { %500 = vst [vmem:[#allocation3] sm:$0x1] %v499_v0 }
 0x196   :  { %511 = dma.vmem_to_hbm [thread:$0]  %s507_s9, 16, %s509_s2, [#allocation4]  }
 0x197   :  { %629 = dma.done.wait [#allocation4], 16  }
 0x198   :  { %630 = vsyncadd [#allocation4], 4294967280 }
 0x199   :  { %516 = vsyncpa [#allocation4], 1 }

</bundles_post_ra>
